<compile_context>
chip_gen: v6e
topology: v6e:2x2x1
jax: 0.10.0
libtpu: 0.0.40
codegen_flags: <defaults>
</compile_context>

<pallas_src>
import functools

import jax
import jax.numpy as jnp
import numpy as np
from jax import lax
from jax.experimental import pallas as pl
from jax.experimental.pallas import tpu as pltpu

N_KERNELS = 5
MUL_FACTOR = 2.0
# bandwidth_multipliers = mul_factor ** arange(n_kernels)  (deterministic "parameters")
BANDWIDTH_MULTIPLIERS = tuple(float(MUL_FACTOR ** k) for k in range(N_KERNELS))


def _block_exp_sum(a, b, sq_a_row, sq_b_col, neg_inv_bw, gram_dtype):
    """sum over the (Na, Nb) block of sum_k exp(-L2 / (bw * 2**k)).

    a: (Na, D), b: (Nb, D) in native dtype; sq_a_row: (Na, 1) f32; sq_b_col: (1, Nb) f32.
    """
    ga = a if gram_dtype is None else a.astype(gram_dtype)
    gb = b if gram_dtype is None else b.astype(gram_dtype)
    # Gram block on the MXU, contracting the last dim of both operands (no transpose),
    # f32 accumulation regardless of operand dtype.
    g = lax.dot_general(ga, gb, (((1,), (1,)), ((), ())),
                        preferred_element_type=jnp.float32)            # (Na, Nb) f32
    l2 = jnp.maximum(sq_a_row + sq_b_col - 2.0 * g, 0.0)               # cdist^2 >= 0
    nl2 = l2 * neg_inv_bw
    # Multi-bandwidth RBF sum: elementwise exp-accumulate (EUP + spare VALU slots),
    # then a single cross-lane reduction for the whole block.
    acc = jnp.exp(nl2 * float(1.0 / BANDWIDTH_MULTIPLIERS[0]))
    for m in BANDWIDTH_MULTIPLIERS[1:]:
        acc = acc + jnp.exp(nl2 * float(1.0 / m))
    return jnp.sum(acc)


def _mmd_kernel(x_ref, y_ref, o_ref, *, nx, ny, d, gram_dtype):
    """Whole MMD loss in one kernel invocation (no grid; N, D fit in VMEM)."""
    n = nx + ny

    x = x_ref[...]                                                     # (Nx, D) native dtype
    y = y_ref[...]                                                     # (Ny, D) native dtype
    xf = x.astype(jnp.float32)
    yf = y.astype(jnp.float32)
    x2 = xf * xf
    y2 = yf * yf

    # Row-side squared norms (sublane-major column vectors).
    sq_x_row = jnp.sum(x2, axis=-1, keepdims=True)                     # (Nx, 1)
    sq_y_row = jnp.sum(y2, axis=-1, keepdims=True)                     # (Ny, 1)

    # Column-side squared norms directly in lane-major (1, N) form via a ones-vector
    # matmul on the MXU (no (N,1)->(1,N) XLU relayout).
    ones_row = jnp.ones((1, d), jnp.float32)
    sq_x_col = lax.dot_general(ones_row, x2, (((1,), (1,)), ((), ())),
                               preferred_element_type=jnp.float32)     # (1, Nx)
    sq_y_col = lax.dot_general(ones_row, y2, (((1,), (1,)), ((), ())),
                               preferred_element_type=jnp.float32)     # (1, Ny)

    # Data-dependent bandwidth from O(N*D) reductions only (never touches an (N,N) array):
    #   sum(L2) = 2*N*sum_i ||z_i||^2 - 2*||sum_i z_i||^2
    sum_sq = jnp.sum(sq_x_row) + jnp.sum(sq_y_row)
    col_sum = (jnp.sum(xf, axis=0, keepdims=True)
               + jnp.sum(yf, axis=0, keepdims=True))                   # (1, D)
    sum_l2 = 2.0 * float(n) * sum_sq - 2.0 * jnp.sum(col_sum * col_sum)
    bw = sum_l2 / float(n * n - n)
    bw = jnp.maximum(bw, 1e-12)      # guard all-identical-rows case (PyTorch NaNs here)
    neg_inv_bw = -1.0 / bw           # the single scalar reciprocal

    # Three Gram blocks; YX = XY^T by symmetry, so the XY block is weighted by -2 instead
    # of being recomputed.
    s_xx = _block_exp_sum(x, x, sq_x_row, sq_x_col, neg_inv_bw, gram_dtype)
    s_xy = _block_exp_sum(x, y, sq_x_row, sq_y_col, neg_inv_bw, gram_dtype)
    s_yy = _block_exp_sum(y, y, sq_y_row, sq_y_col, neg_inv_bw, gram_dtype)

    loss = (s_xx * (1.0 / float(nx * nx))
            - s_xy * (2.0 / float(nx * ny))
            + s_yy * (1.0 / float(ny * ny)))
    o_ref[0, 0] = loss


def mmd_loss(x, y, *, gram_dtype=None):
    """MMD loss between X (Nx, D) and Y (Ny, D); returns a scalar float32.

    gram_dtype: optional dtype (e.g. jnp.bfloat16) used ONLY for the Gram matmuls, with
    f32 accumulation; everything else stays f32.  Default None = native input dtype.
    """
    nx, d = x.shape
    ny, d2 = y.shape
    assert d == d2, "X and Y must share the feature dimension"
    n = nx + ny

    in_bytes = x.size * x.dtype.itemsize + y.size * y.dtype.itemsize
    block_elems = nx * nx + nx * ny + ny * ny
    max_block = max(nx * nx, nx * ny, ny * ny)

    # Scoped-VMEM sizing: inputs (double-buffered by the auto-pipeline) + f32 copies of
    # X/Y + a few live (Na, Nb) f32 temporaries per Gram block, with 2x headroom.
    est = 2 * in_bytes + 2 * (x.size + y.size) * 4 + 4 * max_block * 4
    vmem_limit = int(min(max(2 * est, 8 << 20), 100 << 20))

    out = pl.pallas_call(
        functools.partial(_mmd_kernel, nx=nx, ny=ny, d=d, gram_dtype=gram_dtype),
        out_shape=jax.ShapeDtypeStruct((1, 1), jnp.float32),
        in_specs=[
            pl.BlockSpec((nx, d), lambda: (0, 0)),
            pl.BlockSpec((ny, d), lambda: (0, 0)),
        ],
        out_specs=pl.BlockSpec(memory_space=pltpu.SMEM),
        compiler_params=pltpu.CompilerParams(vmem_limit_bytes=vmem_limit),
        cost_estimate=pl.CostEstimate(
            flops=2 * d * block_elems + (N_KERNELS + 8) * block_elems + 6 * n * d,
            transcendentals=N_KERNELS * block_elems,
            bytes_accessed=in_bytes + 4,
        ),
    )(x, y)
    return out[0, 0]


def _mmd_ref(x, y):
    """Pure-JAX reference (mirrors the PyTorch module) for the correctness check."""
    z = jnp.concatenate([x, y], axis=0).astype(jnp.float32)
    n = z.shape[0]
    sq = jnp.sum(z * z, axis=-1, keepdims=True)
    l2 = jnp.maximum(sq + sq.T - 2.0 * (z @ z.T), 0.0)
    bw = jnp.sum(l2) / (n * n - n)
    k = sum(jnp.exp(-l2 / (bw * m)) for m in BANDWIDTH_MULTIPLIERS)
    nx = x.shape[0]
    xx = jnp.mean(k[:nx, :nx])
    xy = jnp.mean(k[:nx, nx:])
    yy = jnp.mean(k[nx:, nx:])
    return xx - 2.0 * xy + yy


if __name__ == "__main__":
    key = jax.random.PRNGKey(0)
    kx, ky = jax.random.split(key)
    # Small shapes: Nx = Ny = 8 samples, hidden dim 32.
    X = jax.random.normal(kx, (8, 32), dtype=jnp.float32)
    Y = 0.5 * jax.random.normal(ky, (8, 32), dtype=jnp.float32) + 1.0

    loss = jax.block_until_ready(mmd_loss(X, Y))
    ref = jax.block_until_ready(_mmd_ref(X, Y))

    assert np.isfinite(float(loss))
    np.testing.assert_allclose(float(loss), float(ref), rtol=1e-3, atol=1e-4)
    print("KERNEL_OK")
</pallas_src>

<mosaic_0001>
module attributes {stable_mosaic.version = 11 : i64} {
  func.func @_mmd_kernel(%arg0: memref<8x32xf32, #tpu.memory_space<vmem>>, %arg1: memref<8x32xf32, #tpu.memory_space<vmem>>, %arg2: memref<1x1xf32, #tpu.memory_space<smem>>) attributes {dimension_semantics = [], scalar_prefetch = 0 : i64, scratch_operands = 0 : i64, tpu.core_type = #tpu.core_type<tc>} {
    %c0 = arith.constant 0 : index
    %c0_0 = arith.constant 0 : index
    %0 = vector.load %arg0[%c0, %c0_0] : memref<8x32xf32, #tpu.memory_space<vmem>>, vector<8x32xf32>
    %c0_1 = arith.constant 0 : index
    %c0_2 = arith.constant 0 : index
    %1 = vector.load %arg1[%c0_1, %c0_2] : memref<8x32xf32, #tpu.memory_space<vmem>>, vector<8x32xf32>
    %2 = arith.mulf %0, %0 : vector<8x32xf32>
    %3 = arith.mulf %1, %1 : vector<8x32xf32>
    %cst = arith.constant dense<0.000000e+00> : vector<8xf32>
    %4 = vector.multi_reduction <add>, %2, %cst [1] : vector<8x32xf32> to vector<8xf32>
    %5 = vector.shape_cast %4 : vector<8xf32> to vector<8x1xf32>
    %cst_3 = arith.constant dense<0.000000e+00> : vector<8xf32>
    %6 = vector.multi_reduction <add>, %3, %cst_3 [1] : vector<8x32xf32> to vector<8xf32>
    %7 = vector.shape_cast %6 : vector<8xf32> to vector<8x1xf32>
    %cst_4 = arith.constant 1.000000e+00 : f32
    %8 = vector.broadcast %cst_4 : f32 to vector<1x32xf32>
    %cst_5 = arith.constant dense<0.000000e+00> : vector<1x8xf32>
    %9 = tpu.matmul %8, %2, %cst_5 {dimension_numbers = #tpu.dot_dimension_numbers<[1], [1], [0], [0], [0, 0, 1, 0], [], []>} : vector<1x32xf32>, vector<8x32xf32>, vector<1x8xf32> -> vector<1x8xf32>
    %cst_6 = arith.constant dense<0.000000e+00> : vector<1x8xf32>
    %10 = tpu.matmul %8, %3, %cst_6 {dimension_numbers = #tpu.dot_dimension_numbers<[1], [1], [0], [0], [0, 0, 1, 0], [], []>} : vector<1x32xf32>, vector<8x32xf32>, vector<1x8xf32> -> vector<1x8xf32>
    %11 = vector.shape_cast %5 : vector<8x1xf32> to vector<1x8x1xf32>
    %cst_7 = arith.constant dense<0.000000e+00> : vector<1xf32>
    %12 = vector.multi_reduction <add>, %11, %cst_7 [1, 2] : vector<1x8x1xf32> to vector<1xf32>
    %13 = vector.shape_cast %12 : vector<1xf32> to vector<1x1x1xf32>
    %14 = vector.extract %13[0, 0, 0] : f32 from vector<1x1x1xf32>
    %15 = vector.shape_cast %7 : vector<8x1xf32> to vector<1x8x1xf32>
    %cst_8 = arith.constant dense<0.000000e+00> : vector<1xf32>
    %16 = vector.multi_reduction <add>, %15, %cst_8 [1, 2] : vector<1x8x1xf32> to vector<1xf32>
    %17 = vector.shape_cast %16 : vector<1xf32> to vector<1x1x1xf32>
    %18 = vector.extract %17[0, 0, 0] : f32 from vector<1x1x1xf32>
    %19 = arith.addf %14, %18 : f32
    %cst_9 = arith.constant dense<0.000000e+00> : vector<32xf32>
    %20 = vector.multi_reduction <add>, %0, %cst_9 [0] : vector<8x32xf32> to vector<32xf32>
    %21 = vector.shape_cast %20 : vector<32xf32> to vector<1x32xf32>
    %cst_10 = arith.constant dense<0.000000e+00> : vector<32xf32>
    %22 = vector.multi_reduction <add>, %1, %cst_10 [0] : vector<8x32xf32> to vector<32xf32>
    %23 = vector.shape_cast %22 : vector<32xf32> to vector<1x32xf32>
    %24 = arith.addf %21, %23 : vector<1x32xf32>
    %cst_11 = arith.constant 3.200000e+01 : f32
    %25 = arith.mulf %cst_11, %19 : f32
    %26 = arith.mulf %24, %24 : vector<1x32xf32>
    %27 = vector.shape_cast %26 : vector<1x32xf32> to vector<1x1x32xf32>
    %cst_12 = arith.constant dense<0.000000e+00> : vector<1xf32>
    %28 = vector.multi_reduction <add>, %27, %cst_12 [1, 2] : vector<1x1x32xf32> to vector<1xf32>
    %29 = vector.shape_cast %28 : vector<1xf32> to vector<1x1x1xf32>
    %30 = vector.extract %29[0, 0, 0] : f32 from vector<1x1x1xf32>
    %cst_13 = arith.constant 2.000000e+00 : f32
    %31 = arith.mulf %cst_13, %30 : f32
    %32 = arith.subf %25, %31 : f32
    %cst_14 = arith.constant 2.400000e+02 : f32
    %33 = arith.divf %32, %cst_14 : f32
    %cst_15 = arith.constant 9.99999996E-13 : f32
    %34 = arith.maximumf %33, %cst_15 : f32
    %cst_16 = arith.constant -1.000000e+00 : f32
    %35 = arith.divf %cst_16, %34 : f32
    %cst_17 = arith.constant dense<0.000000e+00> : vector<8x8xf32>
    %36 = tpu.matmul %0, %0, %cst_17 {dimension_numbers = #tpu.dot_dimension_numbers<[1], [1], [0], [0], [0, 0, 1, 0], [], []>} : vector<8x32xf32>, vector<8x32xf32>, vector<8x8xf32> -> vector<8x8xf32>
    %37 = vector.broadcast %5 : vector<8x1xf32> to vector<8x8xf32>
    %38 = vector.broadcast %9 : vector<1x8xf32> to vector<8x8xf32>
    %39 = arith.addf %37, %38 : vector<8x8xf32>
    %cst_18 = arith.constant 2.000000e+00 : f32
    %40 = vector.broadcast %cst_18 : f32 to vector<8x8xf32>
    %41 = arith.mulf %40, %36 : vector<8x8xf32>
    %42 = arith.subf %39, %41 : vector<8x8xf32>
    %cst_19 = arith.constant 0.000000e+00 : f32
    %43 = vector.broadcast %cst_19 : f32 to vector<8x8xf32>
    %44 = arith.maximumf %42, %43 : vector<8x8xf32>
    %45 = vector.broadcast %35 : f32 to vector<8x8xf32>
    %46 = arith.mulf %44, %45 : vector<8x8xf32>
    %cst_20 = arith.constant 1.000000e+00 : f32
    %47 = vector.broadcast %cst_20 : f32 to vector<8x8xf32>
    %48 = arith.mulf %46, %47 : vector<8x8xf32>
    %49 = math.exp %48 : vector<8x8xf32>
    %cst_21 = arith.constant 5.000000e-01 : f32
    %50 = vector.broadcast %cst_21 : f32 to vector<8x8xf32>
    %51 = arith.mulf %46, %50 : vector<8x8xf32>
    %52 = math.exp %51 : vector<8x8xf32>
    %53 = arith.addf %49, %52 : vector<8x8xf32>
    %cst_22 = arith.constant 2.500000e-01 : f32
    %54 = vector.broadcast %cst_22 : f32 to vector<8x8xf32>
    %55 = arith.mulf %46, %54 : vector<8x8xf32>
    %56 = math.exp %55 : vector<8x8xf32>
    %57 = arith.addf %53, %56 : vector<8x8xf32>
    %cst_23 = arith.constant 1.250000e-01 : f32
    %58 = vector.broadcast %cst_23 : f32 to vector<8x8xf32>
    %59 = arith.mulf %46, %58 : vector<8x8xf32>
    %60 = math.exp %59 : vector<8x8xf32>
    %61 = arith.addf %57, %60 : vector<8x8xf32>
    %cst_24 = arith.constant 6.250000e-02 : f32
    %62 = vector.broadcast %cst_24 : f32 to vector<8x8xf32>
    %63 = arith.mulf %46, %62 : vector<8x8xf32>
    %64 = math.exp %63 : vector<8x8xf32>
    %65 = arith.addf %61, %64 : vector<8x8xf32>
    %66 = vector.shape_cast %65 : vector<8x8xf32> to vector<1x8x8xf32>
    %cst_25 = arith.constant dense<0.000000e+00> : vector<1xf32>
    %67 = vector.multi_reduction <add>, %66, %cst_25 [1, 2] : vector<1x8x8xf32> to vector<1xf32>
    %68 = vector.shape_cast %67 : vector<1xf32> to vector<1x1x1xf32>
    %69 = vector.extract %68[0, 0, 0] : f32 from vector<1x1x1xf32>
    %cst_26 = arith.constant dense<0.000000e+00> : vector<8x8xf32>
    %70 = tpu.matmul %0, %1, %cst_26 {dimension_numbers = #tpu.dot_dimension_numbers<[1], [1], [0], [0], [0, 0, 1, 0], [], []>} : vector<8x32xf32>, vector<8x32xf32>, vector<8x8xf32> -> vector<8x8xf32>
    %71 = vector.broadcast %5 : vector<8x1xf32> to vector<8x8xf32>
    %72 = vector.broadcast %10 : vector<1x8xf32> to vector<8x8xf32>
    %73 = arith.addf %71, %72 : vector<8x8xf32>
    %cst_27 = arith.constant 2.000000e+00 : f32
    %74 = vector.broadcast %cst_27 : f32 to vector<8x8xf32>
    %75 = arith.mulf %74, %70 : vector<8x8xf32>
    %76 = arith.subf %73, %75 : vector<8x8xf32>
    %cst_28 = arith.constant 0.000000e+00 : f32
    %77 = vector.broadcast %cst_28 : f32 to vector<8x8xf32>
    %78 = arith.maximumf %76, %77 : vector<8x8xf32>
    %79 = vector.broadcast %35 : f32 to vector<8x8xf32>
    %80 = arith.mulf %78, %79 : vector<8x8xf32>
    %cst_29 = arith.constant 1.000000e+00 : f32
    %81 = vector.broadcast %cst_29 : f32 to vector<8x8xf32>
    %82 = arith.mulf %80, %81 : vector<8x8xf32>
    %83 = math.exp %82 : vector<8x8xf32>
    %cst_30 = arith.constant 5.000000e-01 : f32
    %84 = vector.broadcast %cst_30 : f32 to vector<8x8xf32>
    %85 = arith.mulf %80, %84 : vector<8x8xf32>
    %86 = math.exp %85 : vector<8x8xf32>
    %87 = arith.addf %83, %86 : vector<8x8xf32>
    %cst_31 = arith.constant 2.500000e-01 : f32
    %88 = vector.broadcast %cst_31 : f32 to vector<8x8xf32>
    %89 = arith.mulf %80, %88 : vector<8x8xf32>
    %90 = math.exp %89 : vector<8x8xf32>
    %91 = arith.addf %87, %90 : vector<8x8xf32>
    %cst_32 = arith.constant 1.250000e-01 : f32
    %92 = vector.broadcast %cst_32 : f32 to vector<8x8xf32>
    %93 = arith.mulf %80, %92 : vector<8x8xf32>
    %94 = math.exp %93 : vector<8x8xf32>
    %95 = arith.addf %91, %94 : vector<8x8xf32>
    %cst_33 = arith.constant 6.250000e-02 : f32
    %96 = vector.broadcast %cst_33 : f32 to vector<8x8xf32>
    %97 = arith.mulf %80, %96 : vector<8x8xf32>
    %98 = math.exp %97 : vector<8x8xf32>
    %99 = arith.addf %95, %98 : vector<8x8xf32>
    %100 = vector.shape_cast %99 : vector<8x8xf32> to vector<1x8x8xf32>
    %cst_34 = arith.constant dense<0.000000e+00> : vector<1xf32>
    %101 = vector.multi_reduction <add>, %100, %cst_34 [1, 2] : vector<1x8x8xf32> to vector<1xf32>
    %102 = vector.shape_cast %101 : vector<1xf32> to vector<1x1x1xf32>
    %103 = vector.extract %102[0, 0, 0] : f32 from vector<1x1x1xf32>
    %cst_35 = arith.constant dense<0.000000e+00> : vector<8x8xf32>
    %104 = tpu.matmul %1, %1, %cst_35 {dimension_numbers = #tpu.dot_dimension_numbers<[1], [1], [0], [0], [0, 0, 1, 0], [], []>} : vector<8x32xf32>, vector<8x32xf32>, vector<8x8xf32> -> vector<8x8xf32>
    %105 = vector.broadcast %7 : vector<8x1xf32> to vector<8x8xf32>
    %106 = vector.broadcast %10 : vector<1x8xf32> to vector<8x8xf32>
    %107 = arith.addf %105, %106 : vector<8x8xf32>
    %cst_36 = arith.constant 2.000000e+00 : f32
    %108 = vector.broadcast %cst_36 : f32 to vector<8x8xf32>
    %109 = arith.mulf %108, %104 : vector<8x8xf32>
    %110 = arith.subf %107, %109 : vector<8x8xf32>
    %cst_37 = arith.constant 0.000000e+00 : f32
    %111 = vector.broadcast %cst_37 : f32 to vector<8x8xf32>
    %112 = arith.maximumf %110, %111 : vector<8x8xf32>
    %113 = vector.broadcast %35 : f32 to vector<8x8xf32>
    %114 = arith.mulf %112, %113 : vector<8x8xf32>
    %cst_38 = arith.constant 1.000000e+00 : f32
    %115 = vector.broadcast %cst_38 : f32 to vector<8x8xf32>
    %116 = arith.mulf %114, %115 : vector<8x8xf32>
    %117 = math.exp %116 : vector<8x8xf32>
    %cst_39 = arith.constant 5.000000e-01 : f32
    %118 = vector.broadcast %cst_39 : f32 to vector<8x8xf32>
    %119 = arith.mulf %114, %118 : vector<8x8xf32>
    %120 = math.exp %119 : vector<8x8xf32>
    %121 = arith.addf %117, %120 : vector<8x8xf32>
    %cst_40 = arith.constant 2.500000e-01 : f32
    %122 = vector.broadcast %cst_40 : f32 to vector<8x8xf32>
    %123 = arith.mulf %114, %122 : vector<8x8xf32>
    %124 = math.exp %123 : vector<8x8xf32>
    %125 = arith.addf %121, %124 : vector<8x8xf32>
    %cst_41 = arith.constant 1.250000e-01 : f32
    %126 = vector.broadcast %cst_41 : f32 to vector<8x8xf32>
    %127 = arith.mulf %114, %126 : vector<8x8xf32>
    %128 = math.exp %127 : vector<8x8xf32>
    %129 = arith.addf %125, %128 : vector<8x8xf32>
    %cst_42 = arith.constant 6.250000e-02 : f32
    %130 = vector.broadcast %cst_42 : f32 to vector<8x8xf32>
    %131 = arith.mulf %114, %130 : vector<8x8xf32>
    %132 = math.exp %131 : vector<8x8xf32>
    %133 = arith.addf %129, %132 : vector<8x8xf32>
    %134 = vector.shape_cast %133 : vector<8x8xf32> to vector<1x8x8xf32>
    %cst_43 = arith.constant dense<0.000000e+00> : vector<1xf32>
    %135 = vector.multi_reduction <add>, %134, %cst_43 [1, 2] : vector<1x8x8xf32> to vector<1xf32>
    %136 = vector.shape_cast %135 : vector<1xf32> to vector<1x1x1xf32>
    %137 = vector.extract %136[0, 0, 0] : f32 from vector<1x1x1xf32>
    %cst_44 = arith.constant 1.562500e-02 : f32
    %138 = arith.mulf %69, %cst_44 : f32
    %cst_45 = arith.constant 3.125000e-02 : f32
    %139 = arith.mulf %103, %cst_45 : f32
    %140 = arith.subf %138, %139 : f32
    %cst_46 = arith.constant 1.562500e-02 : f32
    %141 = arith.mulf %137, %cst_46 : f32
    %142 = arith.addf %140, %141 : f32
    %c0_47 = arith.constant 0 : index
    %c0_48 = arith.constant 0 : index
    %143 = memref.load %arg2[%c0_47, %c0_48] : memref<1x1xf32, #tpu.memory_space<smem>>
    memref.store %142, %arg2[%c0_47, %c0_48] : memref<1x1xf32, #tpu.memory_space<smem>>
    return
  }
}

</mosaic_0001>

<bundles_post_ra>
// kernel: tpu_custom_call.1
= control target key start
LH: loop header
LB: loop body
LE: loop exit
PB: predicated region body
PF: predicated region fallthrough
CT: control target
= control target key end

     0   :  { %7 = vsyncpa [#allocation3], 0  ;;  %s805_s0 = inlined_call_operand.hbm [shape: f32[8,32], index: 0, kind: input, shape index: {}]   ;;  %s806_s1 = inlined_call_operand.hbm [shape: f32[8,32], index: 1, kind: input, shape index: {}]   ;;  %s807_s2 = inlined_call_operand.hbm [shape: f32[1,1], index: 2, kind: output, shape index: {}]  }
   0x1   :  { %8 = vsyncpa [#allocation6], 0 }
   0x2   :  { %9 = vsyncpa [#allocation4], 0  ;;  %s755_s9 = smov [#allocation2]   ;;  %s756_s11 = smov [#allocation5]  }
   0x3   :  { %s16_s10 = sshll.u32 %s755_s9, 4  ;;  %s26_s12 = sshll.u32 %s756_s11, 4  ;;  %s17_s10 = int_to_ptr.vmem [resolvable:$true] %s16_s10  ;;  %s27_s12 = int_to_ptr.vmem [resolvable:$true] %s26_s12 }
   0x4   :  { %s709_s13 = scalar_lea.vmem %s17_s10, 128  ;;  %p714_p1 = scmp.lt.s32.totalorder %s17_s10, %s17_s10 }
   0x5   :  { %p710_p0 = scmp.ne.s32.totalorder %s17_s10, %s709_s13  ;;  %p715_p2 = scmp.lt.s32.totalorder %s709_s13, %s709_s13 }
   0x7   :  { %p716_p3 = por %p715_p2, %p714_p1 }
   0x9   :  { %p717_p4 = pnand %p716_p3, %p710_p0 }
   0xb   :  { %720 = shalt.err (!%p717_p4)
}
   0xc   :  { %19 = dma.hbm_to_vmem [thread:$0]  %s805_s0, 128, %s17_s10, [#allocation3]  }
   0xd   :  { %s729_s16 = scalar_lea.vmem %s27_s12, 128  ;;  %p734_p6 = scmp.lt.s32.totalorder %s27_s12, %s27_s12 }
   0xe   :  { %p730_p5 = scmp.ne.s32.totalorder %s27_s12, %s729_s16  ;;  %p735_p7 = scmp.lt.s32.totalorder %s729_s16, %s729_s16 }
  0x10   :  { %p736_p8 = por %p735_p7, %p734_p6 }
  0x12   :  { %p737_p9 = pnand %p736_p8, %p730_p5 }
  0x14   :  { %740 = shalt.err (!%p737_p9)
}
  0x15   :  { %29 = dma.hbm_to_vmem [thread:$0]  %s806_s1, 128, %s27_s12, [#allocation6]  }
  0x16   :  { %749 = dma.done.wait [#allocation3], 128  }
  0x17   :  { %750 = vsyncadd [#allocation3], 4294967168 }
  0x18   :  { %751 = dma.done.wait [#allocation6], 128  }
  0x19   :  { %752 = vsyncadd [#allocation6], 4294967168  ;;  %v757_v0 = vmov 0.0   ;;  %vm758_vm0 = vmmov 0   ;;  %v36_v1 = vld [vmem:[#allocation2] sm:$0xff]  ;;  %vm40_vm1 = vcmask 261120   ;;  %v329_v29 = vlaneseq }
  0x1a   :  { %623 = vmatprep.subr.mxu0 %v757_v0  ;;  %628 = vmatprep.subr.mxu1 %v757_v0  ;;  %v37_v2 = vld [vmem:[#allocation5] sm:$0xff]  ;;  %v38_v3 = vmul.f32 %v36_v1, %v36_v1  ;;  %v218_v5 = vsel %vm40_vm1, %v36_v1, 0.0  ;;  %v759_v13 = vmov 1.0   ;;  %vm235_vm2 = vcmask 253952   ;;  %s760_s25 = smov 1e-12  }
  0x1b   :  { %625 = vmatprep.mubr.msk.f32.mxu0 %vm758_vm0, %v757_v0  ;;  %630 = vmatprep.mubr.msk.f32.mxu1 %vm758_vm0, %v757_v0  ;;  %v39_v4 = vmul.f32 %v37_v2, %v37_v2  ;;  %v225_v6 = vsel %vm40_vm1, %v37_v2, 0.0  ;;  %v219_v7 = vrot.slane %v218_v5, 4  ;;  %vm196_vm3 = vcmask 7168   ;;  %s761_s9 = smov [#allocation7]  }
  0x1c   :  { %v226_v8 = vrot.slane %v225_v6, 4  ;;  %624 = vmatpush3.xpose.msk.msra.mxu0 %vm40_vm1, %v38_v3  ;;  %v41_v9 = vsel %vm40_vm1, %v38_v3, 0.0  ;;  %v330_v30 = vshrl.u32 %v329_v29, 7  ;;  %vm357_vm4 = vcmask 64512  }
  0x1d   :  { %629 = vmatpush3.xpose.msk.msra.mxu1 %vm40_vm1, %v39_v4  ;;  %42 = vadd.xlane.f32.xlu0 %v41_v9  ;;  %v220_v10 = vadd.f32 %v219_v7, %v218_v5  ;;  %v44_v12 = vsel %vm40_vm1, %v39_v4, 0.0 }
  0x1e   :  { %633 = vmatprep.subr.mxu0 %v757_v0  ;;  %v227_v11 = vadd.f32 %v226_v8, %v225_v6  ;;  %638 = vmatprep.subr.mxu1 %v757_v0  ;;  %v331_v31 = vsub.s32 0, %v330_v30 }
  0x1f   :  { %626 = vmatmul.mubr.msk.f32.vlgmr.msra.gmra.mxu0 %vm40_vm1, %v759_v13  ;;  %v221_v14 = vrot.slane %v220_v10, 2 }
  0x20   :  { %631 = vmatmul.mubr.msk.f32.vlgmr.msra.gmra.mxu1 %vm40_vm1, %v759_v13  ;;  %v228_v15 = vrot.slane %v227_v11, 2  ;;  %634 = vmatpush3.xpose.msk.msra.mxu0 %vm40_vm1, %v36_v1 }
  0x21   :  { %639 = vmatpush3.xpose.msk.msra.mxu1 %vm40_vm1, %v37_v2  ;;  %45 = vadd.xlane.f32.xlu0 %v44_v12  ;;  %v222_v16 = vadd.f32 %v221_v14, %v220_v10 }
  0x22   :  { %635 = vmatprep.mubr.msk.f32.mxu0 %vm758_vm0, %v757_v0  ;;  %v229_v17 = vadd.f32 %v228_v15, %v227_v11  ;;  %640 = vmatprep.mubr.msk.f32.mxu1 %vm758_vm0, %v757_v0 }
  0x23   :  { %643 = vmatprep.subr.mxu0 %v757_v0  ;;  %636 = vmatmul.mubr.msk.f32.vlgmr.msra.gmra.mxu0 %vm40_vm1, %v36_v1  ;;  %v223_v18 = vrot.slane %v222_v16, 1 }
  0x24   :  { %641 = vmatmul.mubr.msk.f32.vlgmr.msra.gmra.mxu1 %vm40_vm1, %v36_v1  ;;  %v230_v19 = vrot.slane %v229_v17, 1  ;;  %644 = vmatpush3.xpose.msk.msra.mxu0 %vm40_vm1, %v37_v2 }
  0x25   :  { %645 = vmatprep.mubr.msk.f32.mxu0 %vm758_vm0, %v757_v0  ;;  %v224_v20 = vadd.f32 %v223_v18, %v222_v16 }
  0x26   :  { %v231_v21 = vadd.f32 %v230_v19, %v229_v17 }
  0x27   :  { %646 = vmatmul.mubr.msk.f32.vlgmr.msra.gmra.mxu0 %vm40_vm1, %v37_v2 }
  0x28   :  { %v232_v22 = vadd.f32 %v231_v21, %v224_v20 }
  0x2a   :  { %v234_v23 = vmul.f32 %v232_v22, %v232_v22 }
  0x2c   :  { %v236_v24 = vsel %vm235_vm2, %v234_v23, 0.0 }
  0x2d   :  { %237 = vadd.xlane.f32.xlu0 %v236_v24 }
  0xa6   :  { %v43_v25 = vpop.xlane.xlu0 %42 }
  0xa7   :  { %v197_v26 = vsel %vm196_vm3, %v43_v25, 0.0 }
  0xa8   :  { %198 = vadd.xlane.f32.xlu1 %v197_v26 }
  0xaa   :  { %v46_v27 = vpop.xlane.xlu0 %45 }
  0xab   :  { %v207_v28 = vsel %vm196_vm3, %v46_v27, 0.0 }
  0xac   :  { %208 = vadd.xlane.f32.xlu1 %v207_v28 }
  0xb6   :  { %v238_v53 = vpop.xlane.xlu0 %237 }
  0xb7   :  { %v239_v54 = vrot.slane %v238_v53, 4 }
  0xb9   :  { %v240_v56 = vadd.f32 %v239_v54, %v238_v53 }
  0xbb   :  { %v241_v59 = vrot.slane %v240_v56, 2 }
  0xbd   :  { %v242_v1 = vadd.f32 %v241_v59, %v240_v56 }
  0xbf   :  { %v243_v6 = vrot.slane %v242_v1, 1 }
  0xc1   :  { %v244_v9 = vadd.f32 %v243_v6, %v242_v1 }
  0xdf   :  { %v119_v32 = vpop.f32.mrf.mxu0 }
  0xe0   :  { %v192_v33 = vpop.f32.mrf.mxu1  ;;  %v332_v34 = vrot.slane %v119_v32, %v331_v31 }
  0xe1   :  { %v444_v35 = vrot.slane %v192_v33, %v331_v31  ;;  %v627_v36 = vpop.f32.mrf.mxu0 }
  0xe2   :  { %v632_v37 = vpop.f32.mrf.mxu1  ;;  %v333_v38 = vadd.f32 %v332_v34, %v43_v25 }
  0xe3   :  { %v445_v39 = vadd.f32 %v444_v35, %v43_v25  ;;  %v548_v40 = vadd.f32 %v444_v35, %v46_v27  ;;  %v325_v41 = vpop.f32.mrf.mxu0 }
  0xe4   :  { %v437_v42 = vpop.f32.mrf.mxu1  ;;  %v334_v43 = vmul.f32 2.0, %v325_v41 }
  0xe5   :  { %v446_v44 = vmul.f32 2.0, %v437_v42  ;;  %v637_v45 = vpop.f32.mrf.mxu0 }
  0xe6   :  { %v642_v46 = vpop.f32.mrf.mxu1  ;;  %v335_v47 = vsub.f32 %v333_v38, %v334_v43 }
  0xe7   :  { %v447_v48 = vsub.f32 %v445_v39, %v446_v44  ;;  %v544_v49 = vpop.f32.mrf.mxu0 }
  0xe8   :  { %v549_v50 = vmul.f32 2.0, %v544_v49  ;;  %v336_v12 = vmax.f32 %v335_v47, 0.0 }
  0xe9   :  { %v647_v51 = vpop.f32.mrf.mxu0  ;;  %v448_v13 = vmax.f32 %v447_v48, 0.0 }
  0xea   :  { %v550_v52 = vsub.f32 %v548_v40, %v549_v50 }
  0xec   :  { %v551_v17 = vmax.f32 %v550_v52, 0.0 }
 0x131   :  { %v199_v55 = vpop.xlane.xlu1 %198 }
 0x132   :  { %v200_v57 = vrot.slane %v199_v55, 4 }
 0x134   :  { %v201_v58 = vadd.f32 %v200_v57, %v199_v55 }
 0x135   :  { %v209_v60 = vpop.xlane.xlu1 %208 }
 0x136   :  { %v202_v61 = vrot.slane %v201_v58, 2  ;;  %v210_v62 = vrot.slane %v209_v60, 4 }
 0x138   :  { %v211_v63 = vadd.f32 %v210_v62, %v209_v60  ;;  %v203_v0 = vadd.f32 %v202_v61, %v201_v58 }
 0x13a   :  { %v212_v2 = vrot.slane %v211_v63, 2  ;;  %v204_v3 = vrot.slane %v203_v0, 1 }
 0x13c   :  { %v205_v4 = vadd.f32 %v204_v3, %v203_v0  ;;  %v213_v5 = vadd.f32 %v212_v2, %v211_v63 }
 0x13e   :  { %648 = vpush %v205_v4  ;;  %v214_v7 = vrot.slane %v213_v5, 1 }
 0x140   :  { %v215_v8 = vadd.f32 %v214_v7, %v213_v5 }
 0x142   :  { %650 = vpush %v215_v8 }
 0x143   :  { %652 = vpush %v244_v9 }
 0x16f   :  { %s649_s0 = spop %648 }
 0x173   :  { %s651_s1 = spop %650 }
 0x174   :  { %s217_s19 = sadd.f32 %s651_s1, %s649_s0  ;;  %s653_s20 = spop %652 }
 0x175   :  { %s246_s21 = smul.f32 2.0, %s653_s20 }
 0x176   :  { %s233_s22 = smul.f32 32.0, %s217_s19 }
 0x178   :  { %s247_s23 = ssub.f32 %s233_s22, %s246_s21 }
 0x17a   :  { %s250_s24 = smul.f32 0.004166667, %s247_s23 }
 0x17c   :  { %s251_s26 = smax.f32 %s760_s25, %s250_s24 }
 0x17d   :  { %v252_v10 = vstv %s251_s26 }
 0x17e   :  { %669 = vrcp.f32 %v252_v10 }
 0x18b   :  { %v670_v11 = vpop.eup %669 }
 0x18c   :  { %654 = vpush %v670_v11 }
 0x1bd   :  { %s655_s27 = spop %654 }
 0x1be   :  { %s255_s28 = smul.f32 -1.0, %s655_s27 }
 0x1c0   :  { %v337_v14 = vstv %s255_s28 }
 0x1c1   :  { %v338_v15 = vmul.f32 %v337_v14, %v336_v12  ;;  %v449_v16 = vmul.f32 %v448_v13, %v337_v14  ;;  %v552_v25 = vmul.f32 %v551_v17, %v337_v14 }
 0x1c3   :  { %v339_v18 = vmul.f32 1.442695, %v338_v15  ;;  %v341_v19 = vmul.f32 0.5, %v338_v15  ;;  %v345_v20 = vmul.f32 0.25, %v338_v15  ;;  %v349_v21 = vmul.f32 0.125, %v338_v15 }
 0x1c4   :  { %v450_v22 = vmul.f32 1.442695, %v449_v16  ;;  %v452_v23 = vmul.f32 0.5, %v449_v16  ;;  %v456_v24 = vmul.f32 0.25, %v449_v16  ;;  %v460_v31 = vmul.f32 0.125, %v449_v16 }
 0x1c5   :  { %671 = vpow2.f32 %v339_v18  ;;  %v342_v26 = vmul.f32 1.442695, %v341_v19  ;;  %v346_v27 = vmul.f32 1.442695, %v345_v20  ;;  %v350_v28 = vmul.f32 1.442695, %v349_v21 }
 0x1c6   :  { %673 = vpow2.f32 %v450_v22  ;;  %v453_v29 = vmul.f32 1.442695, %v452_v23  ;;  %v457_v30 = vmul.f32 1.442695, %v456_v24  ;;  %v555_v32 = vmul.f32 0.5, %v552_v25 }
 0x1c7   :  { %675 = vpow2.f32 %v342_v26  ;;  %v559_v33 = vmul.f32 0.25, %v552_v25  ;;  %v563_v34 = vmul.f32 0.125, %v552_v25  ;;  %v461_v35 = vmul.f32 1.442695, %v460_v31 }
 0x1c8   :  { %677 = vpow2.f32 %v346_v27  ;;  %v464_v36 = vmul.f32 0.0625, %v449_v16  ;;  %v553_v37 = vmul.f32 1.442695, %v552_v25  ;;  %v353_v38 = vmul.f32 0.0625, %v338_v15 }
 0x1c9   :  { %679 = vpow2.f32 %v350_v28  ;;  %v556_v39 = vmul.f32 1.442695, %v555_v32  ;;  %v560_v40 = vmul.f32 1.442695, %v559_v33  ;;  %v564_v41 = vmul.f32 1.442695, %v563_v34 }
 0x1ca   :  { %681 = vpow2.f32 %v453_v29  ;;  %v567_v42 = vmul.f32 0.0625, %v552_v25  ;;  %v465_v43 = vmul.f32 1.442695, %v464_v36  ;;  %v354_v44 = vmul.f32 1.442695, %v353_v38 }
 0x1cb   :  { %683 = vpow2.f32 %v457_v30 }
 0x1cc   :  { %685 = vpow2.f32 %v461_v35  ;;  %v568_v45 = vmul.f32 1.442695, %v567_v42 }
 0x1cd   :  { %687 = vpow2.f32 %v553_v37 }
 0x1ce   :  { %689 = vpow2.f32 %v556_v39 }
 0x1cf   :  { %691 = vpow2.f32 %v560_v40 }
 0x1d0   :  { %693 = vpow2.f32 %v564_v41 }
 0x1d1   :  { %695 = vpow2.f32 %v465_v43 }
 0x1d2   :  { %v672_v46 = vpop.eup %671  ;;  %697 = vpow2.f32 %v354_v44 }
 0x1d3   :  { %v674_v47 = vpop.eup %673  ;;  %699 = vpow2.f32 %v568_v45 }
 0x1d4   :  { %v676_v48 = vpop.eup %675 }
 0x1d5   :  { %v678_v49 = vpop.eup %677  ;;  %v344_v50 = vadd.f32 %v676_v48, %v672_v46 }
 0x1d6   :  { %v680_v51 = vpop.eup %679 }
 0x1d7   :  { %v682_v52 = vpop.eup %681  ;;  %v348_v55 = vadd.f32 %v678_v49, %v344_v50 }
 0x1d8   :  { %v684_v53 = vpop.eup %683  ;;  %v455_v54 = vadd.f32 %v682_v52, %v674_v47 }
 0x1d9   :  { %v686_v56 = vpop.eup %685  ;;  %v352_v62 = vadd.f32 %v680_v51, %v348_v55 }
 0x1da   :  { %v688_v57 = vpop.eup %687  ;;  %v459_v58 = vadd.f32 %v684_v53, %v455_v54 }
 0x1db   :  { %v690_v59 = vpop.eup %689 }
 0x1dc   :  { %v692_v60 = vpop.eup %691  ;;  %v463_v61 = vadd.f32 %v686_v56, %v459_v58  ;;  %v558_v63 = vadd.f32 %v690_v59, %v688_v57 }
 0x1dd   :  { %v694_v0 = vpop.eup %693 }
 0x1de   :  { %v696_v1 = vpop.eup %695  ;;  %v562_v2 = vadd.f32 %v692_v60, %v558_v63 }
 0x1df   :  { %v698_v3 = vpop.eup %697  ;;  %v467_v4 = vadd.f32 %v696_v1, %v463_v61 }
 0x1e0   :  { %v356_v5 = vadd.f32 %v698_v3, %v352_v62  ;;  %v566_v6 = vadd.f32 %v694_v0, %v562_v2  ;;  %v700_v7 = vpop.eup %699 }
 0x1e1   :  { %v468_v8 = vsel %vm357_vm4, %v467_v4, 0.0 }
 0x1e2   :  { %469 = vadd.xlane.f32.xlu0 %v468_v8  ;;  %v358_v9 = vsel %vm357_vm4, %v356_v5, 0.0  ;;  %v570_v10 = vadd.f32 %v700_v7, %v566_v6 }
 0x1e3   :  { %359 = vadd.xlane.f32.xlu1 %v358_v9 }
 0x1e4   :  { %v571_v11 = vsel %vm357_vm4, %v570_v10, 0.0 }
 0x1e7   :  { %572 = vadd.xlane.f32.xlu1 %v571_v11 }
 0x26b   :  { %v470_v12 = vpop.xlane.xlu0 %469 }
 0x26c   :  { %v471_v13 = vrot.slane %v470_v12, 4  ;;  %v360_v14 = vpop.xlane.xlu1 %359 }
 0x26d   :  { %v361_v15 = vrot.slane %v360_v14, 4 }
 0x26e   :  { %v472_v16 = vadd.f32 %v471_v13, %v470_v12 }
 0x26f   :  { %v362_v17 = vadd.f32 %v361_v15, %v360_v14 }
 0x270   :  { %v473_v18 = vrot.slane %v472_v16, 2  ;;  %v573_v19 = vpop.xlane.xlu1 %572 }
 0x271   :  { %v363_v20 = vrot.slane %v362_v17, 2  ;;  %v574_v21 = vrot.slane %v573_v19, 4 }
 0x272   :  { %v474_v22 = vadd.f32 %v473_v18, %v472_v16 }
 0x273   :  { %v575_v23 = vadd.f32 %v574_v21, %v573_v19  ;;  %v364_v24 = vadd.f32 %v363_v20, %v362_v17 }
 0x274   :  { %v475_v25 = vrot.slane %v474_v22, 1 }
 0x275   :  { %v576_v26 = vrot.slane %v575_v23, 2  ;;  %v365_v27 = vrot.slane %v364_v24, 1 }
 0x276   :  { %v476_v28 = vadd.f32 %v475_v25, %v474_v22 }
 0x277   :  { %v577_v29 = vadd.f32 %v576_v26, %v575_v23  ;;  %v366_v30 = vadd.f32 %v365_v27, %v364_v24 }
 0x279   :  { %656 = vpush %v366_v30  ;;  %v578_v31 = vrot.slane %v577_v29, 1 }
 0x27a   :  { %658 = vpush %v476_v28 }
 0x27b   :  { %v579_v32 = vadd.f32 %v578_v31, %v577_v29 }
 0x27d   :  { %660 = vpush %v579_v32 }
 0x2aa   :  { %s657_s29 = spop %656 }
 0x2ab   :  { %s581_s30 = smul.f32 0.015625, %s657_s29  ;;  %s659_s3 = spop %658 }
 0x2ac   :  { %s582_s4 = smul.f32 0.03125, %s659_s3 }
 0x2ae   :  { %s661_s5 = spop %660  ;;  %s583_s6 = ssub.f32 %s581_s30, %s582_s4 }
 0x2af   :  { %s584_s7 = smul.f32 0.015625, %s661_s5 }
 0x2b1   :  { %s585_s8 = sadd.f32 %s584_s7, %s583_s6 }
 0x2b3   :  { %587 = sst [smem:[#allocation7]] %s585_s8 }
 0x2b4   :  { %595 = dma.smem_to_hbm %s761_s9, 16, %s807_s2, [#allocation4]  }
 0x2b5   :  { %753 = dma.done.wait [#allocation4], 16  }
 0x2b6   :  { %754 = vsyncadd [#allocation4], 4294967280 }
 0x2b7   :  { %599 = sfence }
 0x2b8   :  { %600 = vsyncpa [#allocation3], 1 }
 0x2b9   :  { %601 = vsyncpa [#allocation6], 1 }
 0x2ba   :  { %602 = vsyncpa [#allocation4], 1 }

</bundles_post_ra>
